<compile_context>
chip_gen: v5e
topology: v5e:2x2
jax: 0.10.0
libtpu: 0.0.40
codegen_flags: <defaults>
</compile_context>

<pallas_src>
from functools import partial

import jax
import jax.numpy as jnp
from jax import lax
from jax.experimental import pallas as pl
from jax.experimental.pallas import tpu as pltpu


# ----------------------------------------------------------------------------- kernels
def _sketch_partial_max_kernel(x_ref, w1_ref, b1_ref, w2_ref, pmax_ref,
                               *, hw, tile, mask_tail):
    """y = W2s @ relu(W1s' @ x + b1s'); per-tile channel-wise spatial max."""
    x = x_ref[0]                                                     # (C, T) f32
    h = jnp.dot(w1_ref[...], x.astype(w1_ref.dtype),
                preferred_element_type=jnp.float32) + b1_ref[...]
    h = jnp.maximum(h, 0.0)
    y = jnp.dot(w2_ref[...], h.astype(w2_ref.dtype),
                preferred_element_type=jnp.float32)                  # (C, T)
    if mask_tail:
        # last tile may extend past HW (uneven grid) -> ignore those columns
        t = pl.program_id(1)
        col = t * tile + lax.broadcasted_iota(jnp.int32, (1, y.shape[1]), 1)
        y = jnp.where(col < hw, y, -jnp.inf)
    pmax_ref[0, 0] = jnp.max(y, axis=1, keepdims=True)               # (C, 1)


def _image_att_kernel(x_ref, w1_ref, b1_ref, v_ref, opb_ref, out_ref, att_ref):
    x = x_ref[0]                                                     # (C, T) f32
    h = jnp.dot(w1_ref[...], x.astype(w1_ref.dtype),
                preferred_element_type=jnp.float32) + b1_ref[...]
    h = jnp.maximum(h, 0.0)
    # second image conv + op 1x1 conv + /256 are folded into v (see wrapper),
    # so the attention logits are a single (1,C)@(C,T) matvec.
    att = jnp.dot(v_ref[0], h, preferred_element_type=jnp.float32) + opb_ref[0, 0]
    att_ref[0] = att.astype(att_ref.dtype)                           # (1, T) lane-dense
    out_ref[0] = (x * att).astype(out_ref.dtype)                     # broadcast over C


# ----------------------------------------------------------------------------- tiling
def _vmem_limit_bytes():
    """Generation-aware scoped VMEM limit: ~64 MiB on v5e/v6e (128 MiB VMEM),
    ~48 MiB on v7x (64 MiB VMEM, leave headroom for Mosaic internal scratch)."""
    try:
        cap = int(getattr(pltpu.get_tpu_info(), "vmem_capacity_bytes",
                          128 * 1024 * 1024))
    except Exception:
        cap = 64 * 1024 * 1024  # conservative fallback
    return int(min(64 * 1024 * 1024, (cap * 3) // 4))


def _choose_hw_tile(hw, c, vmem_limit, const_bytes):
    """Largest lane tile T (multiple of 128) such that ~7 live f32 (C, T)
    buffers (double-buffered streaming I/O + in-kernel temporaries) plus the
    constant operands fit under the scoped VMEM limit.  Returns the full row
    only when it fits; never emits a block that would blow VMEM for
    non-128-divisible HW.  For realistic C this keeps T >= 512 lanes."""
    slack = 2 * 1024 * 1024                      # Mosaic internal scratch headroom
    budget = max(vmem_limit - const_bytes - slack, 2 * 1024 * 1024)
    per_lane = 7 * 4 * max(c, 1)                 # ~7 live f32 (C, T) buffers
    t = (budget // per_lane // 128) * 128
    if hw <= 128 or t >= hw:
        return hw                                # single full-row tile (fits budget)
    return max(t, 128)                           # multiple of 128 -> legal for any HW


# ----------------------------------------------------------------------------- wrapper
def attention_forward(image_feats, sketch_feats, params, *,
                      mxu_dtype=jnp.bfloat16, out_dtype=None):
    """image_feats, sketch_feats: (B, C, H, W) float32 (PyTorch NCHW)."""
    B, C, H, W = image_feats.shape
    HW = H * W
    f32 = jnp.float32
    out_dtype = image_feats.dtype if out_dtype is None else out_dtype

    x_img = image_feats.reshape(B, C, HW)   # free reshape — no transpose
    x_sk = sketch_feats.reshape(B, C, HW)   # free reshape — no transpose

    eps = 1e-5

    def fold_bn(w1, b1, bn):
        scale = bn["gamma"] / jnp.sqrt(bn["var"] + eps)
        shift = bn["beta"] - bn["mean"] * scale
        w1f = (w1 * scale[:, None]).astype(mxu_dtype)                # (C, C) bf16 MXU operand
        b1f = (b1 * scale + shift).reshape(C, 1).astype(f32)         # (C, 1) f32 (accum path)
        return w1f, b1f

    w1i, b1i = fold_bn(params["w1_img"], params["b1_img"], params["bn_img"])
    w1s, b1s = fold_bn(params["w1_sk"], params["b1_sk"], params["bn_sk"])
    w2s = params["w2_sk"].astype(mxu_dtype)

    wbytes = jnp.dtype(mxu_dtype).itemsize
    # Single-buffer big constant weight operands (index_map never changes, so
    # the second buffer is dead VMEM — matters on v7x's 64 MiB).  Skipped for
    # tiny weights where it cannot matter.
    weight_mode = pl.Buffered(1) if 2 * C * C * wbytes >= (1 << 20) else None
    weight_bufs = 1 if weight_mode is not None else 2

    vmem_limit = _vmem_limit_bytes()
    const_bytes = weight_bufs * (2 * C * C * wbytes + C * 4)         # pass-1 constants
    T = _choose_hw_tile(HW, C, vmem_limit, const_bytes)
    n_t = -(-HW // T)
    mask_tail = (n_t * T) != HW
    # TODO(synk): optional pl.Buffered(3) on the streaming x specs when T is
    # forced small (huge C) — minor win, omitted to keep the spec set minimal.

    def const_spec(shape):
        idx = lambda b, t, _nd=len(shape): (0,) * _nd
        if weight_mode is None:
            return pl.BlockSpec(shape, idx)
        return pl.BlockSpec(shape, idx, pipeline_mode=weight_mode)

    # ---- pass 1: sketch branch -> per-tile channel max (no accumulator) ------
    partial_max = pl.pallas_call(
        partial(_sketch_partial_max_kernel, hw=HW, tile=T, mask_tail=mask_tail),
        out_shape=jax.ShapeDtypeStruct((B, n_t, C, 1), f32),
        grid=(B, n_t),
        in_specs=[
            pl.BlockSpec((1, C, T), lambda b, t: (b, 0, t)),         # x_sk tile
            const_spec((C, C)),                                      # w1s (BN folded, bf16)
            const_spec((C, 1)),                                      # b1s (BN folded, f32)
            const_spec((C, C)),                                      # w2s (bf16)
        ],
        out_specs=pl.BlockSpec((1, 1, C, 1), lambda b, t: (b, t, 0, 0)),
        compiler_params=pltpu.CompilerParams(
            dimension_semantics=("parallel", "parallel"),
            vmem_limit_bytes=vmem_limit,
        ),
    )(x_sk, w1s, b1s, w2s)

    # tiny associative fold of the per-tile maxes (B * n_t * C * 4 bytes)
    sk_max = jnp.max(partial_max[..., 0], axis=1)                    # (B, C)

    # ---- tiny host-side fold: second image conv + op conv + /256 -------------
    #   att = sk_max . (W2i @ h_img) * op_w/256 + op_b/256
    #       = ((sk_max @ W2i) * op_w/256) . h_img + op_b/256
    op_w = params["op_w"].reshape(()).astype(f32)
    op_b = params["op_b"].reshape(()).astype(f32)
    v = jnp.einsum("bo,oc->bc", sk_max, params["w2_img"].astype(f32))
    v = (v * (op_w / 256.0)).reshape(B, 1, C).astype(f32)
    opb = (op_b / 256.0).reshape(1, 1)

    # ---- pass 2: image branch + attention + weighting ------------------------
    out_feats, att_map = pl.pallas_call(
        _image_att_kernel,
        out_shape=(
            jax.ShapeDtypeStruct((B, C, HW), out_dtype),
            jax.ShapeDtypeStruct((B, 1, HW), out_dtype),
        ),
        grid=(B, n_t),
        in_specs=[
            pl.BlockSpec((1, C, T), lambda b, t: (b, 0, t)),         # x_img tile
            const_spec((C, C)),                                      # w1i (BN folded, bf16)
            const_spec((C, 1)),                                      # b1i (BN folded, f32)
            pl.BlockSpec((1, 1, C), lambda b, t: (b, 0, 0)),         # v (folded w2i/op, per-batch)
            pl.BlockSpec(memory_space=pltpu.MemorySpace.SMEM),       # op_b / 256 scalar
        ],
        out_specs=(
            pl.BlockSpec((1, C, T), lambda b, t: (b, 0, t)),
            pl.BlockSpec((1, 1, T), lambda b, t: (b, 0, t)),         # lane-dense att row
        ),
        compiler_params=pltpu.CompilerParams(
            dimension_semantics=("parallel", "parallel"),
            vmem_limit_bytes=vmem_limit,
        ),
    )(x_img, w1i, b1i, v, opb)

    attention_feats = out_feats.reshape(B, C, H, W)   # free reshape
    attention_map = att_map.reshape(B, 1, H, W)       # free reshape
    return attention_feats, sketch_feats, attention_map


# ----------------------------------------------------------------------------- reference
def ref_forward(image_feats, sketch_feats, params):
    """Pure-JAX f32 reference mirroring the PyTorch forward (NCHW, eval-mode BN)."""
    eps = 1e-5

    def theta(x, w1, b1, bn, w2):
        y = jnp.einsum("oc,bchw->bohw", w1, x) + b1[None, :, None, None]
        y = (y - bn["mean"][None, :, None, None]) / jnp.sqrt(
            bn["var"][None, :, None, None] + eps
        ) * bn["gamma"][None, :, None, None] + bn["beta"][None, :, None, None]
        y = jnp.maximum(y, 0.0)
        return jnp.einsum("oc,bchw->bohw", w2, y)

    img = theta(image_feats, params["w1_img"], params["b1_img"], params["bn_img"], params["w2_img"])
    skt = theta(sketch_feats, params["w1_sk"], params["b1_sk"], params["bn_sk"], params["w2_sk"])
    B, C, H, W = img.shape
    x_img = image_feats.reshape(B, C, -1)
    sk_max = jnp.max(skt.reshape(B, C, -1), axis=2)                  # (B, C)
    att = jnp.einsum("bc,bcn->bn", sk_max, img.reshape(B, C, -1))[:, None, :]
    att = (att * params["op_w"].reshape(()) + params["op_b"].reshape(())) / 256.0
    att_map = att.reshape(B, 1, H, W)
    out = (x_img * att).reshape(B, C, H, W)
    return out, sketch_feats, att_map


def make_params(key, C):
    ks = jax.random.split(key, 10)
    bound = (6.0 / (C + C)) ** 0.5  # xavier_uniform for a 1x1 conv
    params = {
        "w1_img": jax.random.uniform(ks[0], (C, C), jnp.float32, -bound, bound),
        "b1_img": 0.1 * jax.random.normal(ks[1], (C,), jnp.float32),
        "w2_img": 0.2 * jax.random.normal(ks[2], (C, C), jnp.float32),
        "w1_sk": jax.random.uniform(ks[3], (C, C), jnp.float32, -bound, bound),
        "b1_sk": 0.1 * jax.random.normal(ks[4], (C,), jnp.float32),
        "w2_sk": 0.2 * jax.random.normal(ks[5], (C, C), jnp.float32),
        "op_w": jax.random.uniform(ks[6], (1,), jnp.float32, -1.0, 1.0),
        "op_b": 0.05 * jax.random.normal(ks[7], (1,), jnp.float32),
        "bn_img": {
            "gamma": 1.0 + 0.1 * jax.random.normal(ks[8], (C,), jnp.float32),
            "beta": 0.05 * jnp.ones((C,), jnp.float32),
            "mean": 0.02 * jnp.ones((C,), jnp.float32),
            "var": jnp.full((C,), 0.9, jnp.float32),
        },
        "bn_sk": {
            "gamma": 1.0 + 0.1 * jax.random.normal(ks[9], (C,), jnp.float32),
            "beta": -0.05 * jnp.ones((C,), jnp.float32),
            "mean": -0.02 * jnp.ones((C,), jnp.float32),
            "var": jnp.full((C,), 1.1, jnp.float32),
        },
    }
    return params


if __name__ == "__main__":
    B, C, H, W = 2, 8, 16, 16
    key = jax.random.PRNGKey(0)
    k_img, k_sk, k_par = jax.random.split(key, 3)
    image_feats = jax.random.normal(k_img, (B, C, H, W), jnp.float32)
    sketch_feats = jax.random.normal(k_sk, (B, C, H, W), jnp.float32)
    params = make_params(k_par, C)

    out_feats, sk_out, att_map = attention_forward(image_feats, sketch_feats, params)
    jax.block_until_ready((out_feats, sk_out, att_map))

    # sanity check vs pure-f32 reference (tolerance loosened for bf16 MXU operands)
    r_feats, r_sk, r_map = ref_forward(image_feats, sketch_feats, params)
    assert out_feats.shape == (B, C, H, W)
    assert att_map.shape == (B, 1, H, W)
    assert jnp.allclose(out_feats, r_feats, atol=2e-2, rtol=2e-2)
    assert jnp.allclose(att_map, r_map, atol=2e-2, rtol=2e-2)
    assert jnp.allclose(sk_out, sketch_feats)

    print("KERNEL_OK")
</pallas_src>

<mosaic_0001>
module attributes {stable_mosaic.version = 11 : i64} {
  func.func @_sketch_partial_max_kernel(%arg0: i32, %arg1: i32, %arg2: memref<1x8x256xf32, #tpu.memory_space<vmem>>, %arg3: memref<8x8xbf16, #tpu.memory_space<vmem>>, %arg4: memref<8x1xf32, #tpu.memory_space<vmem>>, %arg5: memref<8x8xbf16, #tpu.memory_space<vmem>>, %arg6: memref<1x1x8x1xf32, #tpu.memory_space<vmem>>) attributes {dimension_semantics = [#tpu.dimension_semantics<parallel>, #tpu.dimension_semantics<parallel>], iteration_bounds = array<i64: 2, 1>, scalar_prefetch = 0 : i64, scratch_operands = 0 : i64, tpu.core_type = #tpu.core_type<tc>, window_params = [{transform_indices = @transform_0, window_bounds = array<i64: 1, 8, 256>}, {pipeline_mode = #tpu.pipeline_mode<synchronous>, transform_indices = @transform_1, window_bounds = array<i64: 8, 8>}, {pipeline_mode = #tpu.pipeline_mode<synchronous>, transform_indices = @transform_2, window_bounds = array<i64: 8, 1>}, {pipeline_mode = #tpu.pipeline_mode<synchronous>, transform_indices = @transform_3, window_bounds = array<i64: 8, 8>}, {transform_indices = @transform_4, window_bounds = array<i64: 1, 1, 8, 1>}]} {
    %c0 = arith.constant 0 : index
    %c0_0 = arith.constant 0 : index
    %c0_1 = arith.constant 0 : index
    %0 = vector.load %arg2[%c0, %c0_0, %c0_1] : memref<1x8x256xf32, #tpu.memory_space<vmem>>, vector<1x8x256xf32>
    %1 = vector.shape_cast %0 : vector<1x8x256xf32> to vector<8x256xf32>
    %c0_2 = arith.constant 0 : index
    %c0_3 = arith.constant 0 : index
    %2 = vector.load %arg3[%c0_2, %c0_3] : memref<8x8xbf16, #tpu.memory_space<vmem>>, vector<8x8xbf16>
    %3 = arith.truncf %1 : vector<8x256xf32> to vector<8x256xbf16>
    %cst = arith.constant dense<0.000000e+00> : vector<8x256xf32>
    %4 = tpu.matmul %2, %3, %cst {dimension_numbers = #tpu.dot_dimension_numbers<[1], [0], [0], [1], [0, 0, 1, 1], [], []>} : vector<8x8xbf16>, vector<8x256xbf16>, vector<8x256xf32> -> vector<8x256xf32>
    %c0_4 = arith.constant 0 : index
    %c0_5 = arith.constant 0 : index
    %5 = vector.load %arg4[%c0_4, %c0_5] : memref<8x1xf32, #tpu.memory_space<vmem>>, vector<8x1xf32>
    %6 = vector.broadcast %5 : vector<8x1xf32> to vector<8x256xf32>
    %7 = arith.addf %4, %6 : vector<8x256xf32>
    %cst_6 = arith.constant 0.000000e+00 : f32
    %8 = vector.broadcast %cst_6 : f32 to vector<8x256xf32>
    %9 = arith.maximumf %7, %8 : vector<8x256xf32>
    %c0_7 = arith.constant 0 : index
    %c0_8 = arith.constant 0 : index
    %10 = vector.load %arg5[%c0_7, %c0_8] : memref<8x8xbf16, #tpu.memory_space<vmem>>, vector<8x8xbf16>
    %11 = arith.truncf %9 : vector<8x256xf32> to vector<8x256xbf16>
    %cst_9 = arith.constant dense<0.000000e+00> : vector<8x256xf32>
    %12 = tpu.matmul %10, %11, %cst_9 {dimension_numbers = #tpu.dot_dimension_numbers<[1], [0], [0], [1], [0, 0, 1, 1], [], []>} : vector<8x8xbf16>, vector<8x256xbf16>, vector<8x256xf32> -> vector<8x256xf32>
    %cst_10 = arith.constant dense<0xFF800000> : vector<8xf32>
    %13 = vector.multi_reduction <maximumf>, %12, %cst_10 [1] : vector<8x256xf32> to vector<8xf32>
    %14 = vector.shape_cast %13 : vector<8xf32> to vector<8x1xf32>
    %c0_11 = arith.constant 0 : index
    %c0_12 = arith.constant 0 : index
    %c0_13 = arith.constant 0 : index
    %c0_14 = arith.constant 0 : index
    %15 = vector.load %arg6[%c0_11, %c0_12, %c0_13, %c0_14] : memref<1x1x8x1xf32, #tpu.memory_space<vmem>>, vector<1x1x8x1xf32>
    %16 = vector.shape_cast %15 : vector<1x1x8x1xf32> to vector<8x1xf32>
    %17 = vector.shape_cast %14 : vector<8x1xf32> to vector<1x1x8x1xf32>
    tpu.vector_store %arg6[%c0_11, %c0_12, %c0_13, %c0_14], %17 {strides = array<i32>} : memref<1x1x8x1xf32, #tpu.memory_space<vmem>>, vector<1x1x8x1xf32>,
    return
  }
  func.func @transform_0(%arg0: i32, %arg1: i32) -> (i32, i32, i32) {
    %c0_i32 = arith.constant 0 : i32
    %c0_i32_0 = arith.constant 0 : i32
    return %arg0, %c0_i32, %arg1 : i32, i32, i32
  }
  func.func @transform_1(%arg0: i32, %arg1: i32) -> (i32, i32) {
    %c0_i32 = arith.constant 0 : i32
    %c0_i32_0 = arith.constant 0 : i32
    %c0_i32_1 = arith.constant 0 : i32
    return %c0_i32, %c0_i32_0 : i32, i32
  }
  func.func @transform_2(%arg0: i32, %arg1: i32) -> (i32, i32) {
    %c0_i32 = arith.constant 0 : i32
    %c0_i32_0 = arith.constant 0 : i32
    %c0_i32_1 = arith.constant 0 : i32
    return %c0_i32, %c0_i32_0 : i32, i32
  }
  func.func @transform_3(%arg0: i32, %arg1: i32) -> (i32, i32) {
    %c0_i32 = arith.constant 0 : i32
    %c0_i32_0 = arith.constant 0 : i32
    %c0_i32_1 = arith.constant 0 : i32
    return %c0_i32, %c0_i32_0 : i32, i32
  }
  func.func @transform_4(%arg0: i32, %arg1: i32) -> (i32, i32, i32, i32) {
    %c0_i32 = arith.constant 0 : i32
    %c0_i32_0 = arith.constant 0 : i32
    %c0_i32_1 = arith.constant 0 : i32
    return %arg0, %arg1, %c0_i32, %c0_i32_0 : i32, i32, i32, i32
  }
}

</mosaic_0001>

<bundles_post_ra>
// kernel: tpu_custom_call.1
= control target key start
LH: loop header
LB: loop body
LE: loop exit
PB: predicated region body
PF: predicated region fallthrough
CT: control target
= control target key end

     0   :  { %9 = vsyncpa [#allocation3], 0  ;;  %s708_s0 = inlined_call_operand.hbm [shape: f32[2,8,256], index: 0, kind: input, shape index: {}]   ;;  %s709_s1 = inlined_call_operand.vmem [shape: bf16[8,8], index: 1, kind: input, shape index: {}]   ;;  %s710_s2 = inlined_call_operand.vmem [shape: f32[8,1], index: 2, kind: input, shape index: {}]   ;;  %s711_s3 = inlined_call_operand.vmem [shape: bf16[8,8], index: 3, kind: input, shape index: {}]   ;;  %s712_s4 = inlined_call_operand.vmem [shape: f32[2,1,8,1], index: 4, kind: output, shape index: {}]  }
   0x1   :  { %11 = vsyncpa [#allocation3 + $0x1], 0  ;;  %s603_s15 = smov 0   ;;  %s605_s16 = smov 0  }
   0x2   :  { %s607_s17 = smov 0   ;;  %s609_s18 = smov 0  }
   0x3   :  { %s611_s19 = smov 0   ;;  %s613_s20 = smov 0  }
   0x4 LB: > { %s421_s21 = sadd.s32 4294967295, %s575_s20   ;;  %s29_s22 = sadd.s32 1, %s571_s19  ;;  %s575_s20 = sphi %s613_s20, %s17_s20   ;;  %s571_s19 = sphi %s611_s19, %s719_s19   ;;  %s567_s18 = sphi %s609_s18, %s718_s18   ;;  %s563_s17 = sphi %s607_s17, %s717_s17   ;;  %s559_s16 = sphi %s605_s16, %s716_s16   ;;  %s555_s15 = sphi %s603_s15, %s715_s15  }
   0x5   : > { %p31_p0 = scmp.ge.s32.totalorder %s29_s22, 2  ;;  %s38_s23 = sadd.s32 1, %s563_s17 }
   0x6   : > { %p45_p1 = scmp.ne.s32.totalorder %s563_s17, %s559_s16  ;;  %p46_p2 = scmp.eq.s32.totalorder %s575_s20, 0 }
   0x7   : > { %s721_s22 = smov (%p31_p0, %s29_s22), 0  ;;  %p51_p4 = scmp.ne.s32.totalorder %s559_s16, %s555_s15 }
   0x8   : > { %p639_p3 = por %p46_p2, %p45_p1  ;;  %s33_s25 = ssub.s32 %s571_s19, %s721_s22 }
   0x9   : > { %p52_p5 = scmp.eq.s32.totalorder %s421_s21, 0  ;;  %p36_p6 = scmp.eq.s32.totalorder %s33_s25, 0 }
   0xa   : > { %p444_p8 = scmp.lt.s32.totalorder %s575_s20, 2  ;;  %s175_s28 = sand.u32 1, %s563_s17  }
   0xb   : > { %p646_p7 = por %p52_p5, %p51_p4  ;;  %s437_s29 = sshll.u32 %s571_s19, 4 }
   0xc   : > { %s652_s27 = scalar_select %p36_p6, %s563_s17, %s38_s23  }
   0xd   : > { %s425_s30 = sshll.u32 %s175_s28, 4  ;;  %s186_s7 = scalar_lea.hbm %s708_s0, %s437_s29 }
   0xe   : > { %s188_s8 = sshll.u32 %s186_s7, 4  ;;  %s179_s9 = scalar_lea.vmem [#allocation2], %s425_s30  ;;  %s189_s8 = int_to_ptr.hbm [resolvable:$true] %s188_s8 }
   0xf   : > { %s190_s10 = sshll.u32 %s179_s9, 4  ;;  %p441_p9 = pnand %p444_p8, %p639_p3  ;;  %s191_s10 = int_to_ptr.vmem [resolvable:$true] %s190_s10 }
  0x10   : > { %p428_p10 = scmp.ge.s32.totalorder %s575_s20, 1  ;;  %p195_p11 = scmp.lt.s32.totalorder %s575_s20, 3 }
  0x11   : > { %s176_s11 = scalar_lea.sflag [#allocation3], %s175_s28 }
  0x12   : > { %443 = dma.hbm_to_vmem [thread:$0]  (!%p441_p9), %s189_s8, 256, %s191_s10, %s176_s11  }
  0x13   : > { %p196_p12 = pnand %p428_p10, %p195_p11 }
  0x14   : > { %s201_s12 = sand.u32 (!%p196_p12), 1, %s559_s16  }
  0x15   : > { %199 = sbr.rel (%p196_p12) target bundleno = 421 (0x1a5), region = 36  ;;  %s429_s13 = sshll.u32 (!%p196_p12), %s201_s12, 4 }
  0x16   : > { %s202_s14 = scalar_lea.sflag (!%p196_p12), [#allocation3], %s201_s12  ;;  %s205_s15 = scalar_lea.vmem (!%p196_p12), [#allocation2], %s429_s13 }
  0x1a   : > { %550 = dma.done.wait (%p646_p7), %s202_s14, 256  }
  0x1b   : > { %552 = vsyncadd (%p646_p7), %s202_s14, 4294967040  ;;  %v577_v0 = vmov 0   ;;  %v242_v1 = vld [vmem:[%s205_s15] sm:$0xff]  ;;  %vm257_vm0 = vcmask 1043456   ;;  %v243_v2 = vld [vmem:[%s205_s15 + $0x8] sm:$0xff]  ;;  %vm253_vm1 = vcmask 64512  }
  0x1c   : > { %494 = vset.pattern.permute.xlu0 %v577_v0  ;;  %v245_v3 = vpack.c.bf16 %v242_v1, %v242_v1  ;;  %v246_v4 = vpack.c.bf16 %v243_v2, %v243_v2  ;;  %v247_v5 = vld [vmem:[%s710_s2] sm:$0xff]  ;;  %p234_p13 = scmp.lt.s32.totalorder %s567_s18, 1  ;;  %vm333_vm2 = vcmask 7168  }
  0x1d   : > { %250 = vperm.xlu0 %494, %v247_v5   ;;  %v244_v8 = vld [vmem:[%s709_s1] sm:$0xf] }
  0x1e   : > { %v259_v6 = vsel %vm257_vm0, %v245_v3, 0  ;;  %v262_v7 = vsel %vm257_vm0, %v246_v4, 0  ;;  %v292_v22 = vld [vmem:[%s711_s3] sm:$0xf]  ;;  %s723_s18 = smov (!%p234_p13, %s567_s18), 1 }
  0x1f   : > { %271 = vmatpush.bf16.msra.mxu0 %v259_v6  ;;  %284 = vmatpush.bf16.msra.mxu1 %v262_v7  ;;  %s430_s29 = sshll.u32 %s723_s18, 3 }
  0x20   : > { %s240_s6 = scalar_lea.vmem %s712_s4, %s430_s29 }
  0x22   : > { %431 = vmatmul.msk.bf16.vlgmr.msra.gmra.mxu0 %vm253_vm1, %v244_v8  ;;  %432 = vmatmul.msk.bf16.vlgmr.msra.gmra.mxu1 %vm253_vm1, %v244_v8 }
  0x8f   : > { %v251_v9 = vpop.permute.xlu0 %250 }
  0x9f   : > { %v273_v10 = vpop.f32.mrf.mxu0  ;;  %v286_v11 = vpop.f32.mrf.mxu1 }
  0xa0   : > { %v274_v12 = vadd.f32 %v273_v10, %v251_v9  ;;  %v287_v13 = vadd.f32 %v286_v11, %v251_v9 }
  0xa2   : > { %v290_v14 = vmax.f32 %v274_v12, 0.0  ;;  %v291_v15 = vmax.f32 %v287_v13, 0.0 }
  0xa4   : > { %v293_v16 = vpack.c.bf16 %v290_v14, %v290_v14  ;;  %v294_v17 = vpack.c.bf16 %v291_v15, %v291_v15 }
  0xa6   : > { %v299_v18 = vsel %vm257_vm0, %v293_v16, 0  ;;  %v302_v19 = vsel %vm257_vm0, %v294_v17, 0 }
  0xa7   : > { %v275_v20 = vpop.f32.mrf.mxu0  ;;  %v288_v21 = vpop.f32.mrf.mxu1  ;;  %311 = vmatpush.bf16.msra.mxu2 %v299_v18  ;;  %324 = vmatpush.bf16.msra.mxu3 %v302_v19 }
  0xaa   : > { %433 = vmatmul.msk.bf16.vlgmr.msra.gmra.mxu2 %vm253_vm1, %v292_v22  ;;  %434 = vmatmul.msk.bf16.vlgmr.msra.gmra.mxu3 %vm253_vm1, %v292_v22 }
 0x12d   : > { %v313_v23 = vpop.f32.mrf.mxu2  ;;  %v326_v24 = vpop.f32.mrf.mxu3 }
 0x12e   : > { %v330_v25 = vmax.f32 %v313_v23, %v326_v24 }
 0x130   : > { %331 = vmax.xlane.f32.xlu0 %v330_v25 }
 0x135   : > { %v315_v26 = vpop.f32.mrf.mxu2  ;;  %v328_v27 = vpop.f32.mrf.mxu3 }
 0x1a3   : > { %v332_v28 = vpop.xlane.xlu0 %331 }
 0x1a4   : > { %334 = vst.msk [vmem:[%s240_s6] sm:$0xff] %vm333_vm2, %v332_v28 }
 0x1a5 PF: > { %s17_s20 = sadd.s32 1, %s575_s20   ;;  %s715_s15 = smov %s559_s16 }
 0x1a6   : > { %p14_p0 = scmp.ge.s32.totalorder %s17_s20, 4   ;;  %s716_s16 = smov %s563_s17 }
 0x1a7   : > { %s717_s17 = smov %s652_s27  ;;  %s718_s18 = smov %s571_s19 }
 0x1a8   : > { %s719_s19 = smov %s721_s22  ;;  %16 = sbr.rel (!%p14_p0) target bundleno = 4 (0x4), region = 76 }
 0x1ad   :  { %360 = vsyncpa [#allocation3], 1 }
 0x1ae   :  { %362 = vsyncpa [#allocation3 + $0x1], 1 }

</bundles_post_ra>
